<compile_context>
chip_gen: v7x
topology: tpu7x:2x2x1
jax: 0.10.0
libtpu: 0.0.40
codegen_flags: <defaults>
</compile_context>

<pallas_src>
import functools

import jax
import jax.numpy as jnp
from jax.experimental import pallas as pl
from jax.experimental.pallas import tpu as pltpu

_LN_EPS = 1e-5
_INV_SQRT2 = 0.7071067811865476  # 1/sqrt(2), hoisted Python constant


def _gelu_exact(x):
    # PyTorch nn.GELU() default = exact erf formulation.
    return x * 0.5 * (1.0 + jax.lax.erf(x * _INV_SQRT2))


def _ceil_to(x, m):
    return ((x + m - 1) // m) * m


def _floor_to(x, m):
    return (x // m) * m


def _resident_spec(shape):
    """BlockSpec for a grid-invariant parameter input: full-array block, single-buffered.

    The index_map is constant, so a second pipeline buffer is pure VMEM waste.  Falls back to the
    default (double-buffered) spec if this JAX version does not support pipeline_mode.
    """
    nd = len(shape)
    index_map = lambda i: (0,) * nd
    try:
        return pl.BlockSpec(shape, index_map, pipeline_mode=pl.Buffered(1))
    except TypeError:  # older signature without pipeline_mode
        return pl.BlockSpec(shape, index_map)


def _ffn_kernel(*refs, n_layers, n_hidden, norm_dims, compute_dtype):
    """Fully fused forward pass: h -> [Linear -> LN -> GELU] x n_hidden -> Linear.

    refs layout (all VMEM):
      refs[0]                         : (TB, Pin0)     padded activations (padded lanes are zero)
      refs[1 : 1+L]                   : (Pin_l, Pout_l) per-layer weights, pre-cast to compute_dtype
      refs[1+L : 1+2L]                : (1, Pout_l)    per-layer biases (f32)
      refs[1+2L : 1+2L+NH]            : (1, Pout_l)    LayerNorm gammas (f32)
      refs[1+2L+NH : 1+2L+2NH]        : (1, Pout_l)    LayerNorm betas  (f32)
      refs[-1]                        : (TB, Pout_last) output
    """
    x_ref = refs[0]
    w_refs = refs[1:1 + n_layers]
    b_refs = refs[1 + n_layers:1 + 2 * n_layers]
    g_refs = refs[1 + 2 * n_layers:1 + 2 * n_layers + n_hidden]
    be_refs = refs[1 + 2 * n_layers + n_hidden:1 + 2 * n_layers + 2 * n_hidden]
    o_ref = refs[1 + 2 * n_layers + 2 * n_hidden]

    h = x_ref[...].astype(jnp.float32)

    for l in range(n_hidden):
        # MXU matmul: bf16 (or f32) operands, f32 accumulation.  Weights already in compute_dtype.
        z = jnp.dot(h.astype(compute_dtype), w_refs[l][...],
                    preferred_element_type=jnp.float32)
        z = z + b_refs[l][...]                              # (TB, Pout_l) + (1, Pout_l)
        # LayerNorm over the real feature width. Padded lanes of z are exactly 0
        # (zero-padded inputs/weights/bias), so full-width sums equal real-width sums.
        inv_n = jnp.float32(1.0 / norm_dims[l])
        s1 = jnp.sum(z, axis=-1, keepdims=True)
        s2 = jnp.sum(z * z, axis=-1, keepdims=True)         # single fused pass over z
        mean = s1 * inv_n
        var = jnp.maximum(s2 * inv_n - mean * mean, 0.0)     # clamp: avoid rsqrt of negative
        zn = (z - mean) * jax.lax.rsqrt(var + _LN_EPS)
        # Padded gamma/beta are zero -> padded lanes return to exactly 0 before GELU.
        h = _gelu_exact(zn * g_refs[l][...] + be_refs[l][...])
        # nn.Dropout(0.5) in eval mode == identity.

    # Final output Linear (no norm / activation).
    z = jnp.dot(h.astype(compute_dtype), w_refs[n_hidden][...],
                preferred_element_type=jnp.float32)
    o_ref[...] = (z + b_refs[n_hidden][...]).astype(o_ref.dtype)


def init_params(key, input_size, hidden_sizes, output_size):
    """PyTorch-style init: Linear U(-1/sqrt(fan_in), 1/sqrt(fan_in)); LayerNorm w=1, b=0.
    Weights stored pre-transposed as [in, out] so the kernel computes x @ W + b."""
    sizes = [input_size] + list(hidden_sizes) + [output_size]
    params = {"linears": [], "norms": []}
    for i in range(len(sizes) - 1):
        fan_in, fan_out = sizes[i], sizes[i + 1]
        key, kw, kb = jax.random.split(key, 3)
        bound = 1.0 / jnp.sqrt(jnp.float32(fan_in))
        w = jax.random.uniform(kw, (fan_in, fan_out), jnp.float32, -bound, bound)
        b = jax.random.uniform(kb, (fan_out,), jnp.float32, -bound, bound)
        params["linears"].append((w, b))
    for h in hidden_sizes:
        params["norms"].append((jnp.ones((h,), jnp.float32), jnp.zeros((h,), jnp.float32)))
    return params


@functools.partial(jax.jit, static_argnames=("compute_dtype",))
def feedforward_nn(x, params, *, compute_dtype=jnp.bfloat16):
    linears = params["linears"]
    norms = params["norms"]
    n_layers = len(linears)
    n_hidden = len(norms)

    batch, input_size = x.shape
    real_sizes = (int(linears[0][0].shape[0]),) + tuple(int(w.shape[1]) for (w, _) in linears)
    hidden_sizes = real_sizes[1:-1]
    output_size = real_sizes[-1]
    # Per-layer lane-dense widths: each feature dim padded to its OWN multiple of 128.
    padded = tuple(_ceil_to(s, 128) for s in real_sizes)
    p_in, p_out = padded[0], padded[-1]
    widest = max(padded)

    # ---- Batch tiling: >=2 parallel grid steps when possible (v7x: 2 TensorCores), tile size
    #      budgeted against VMEM (~4 MiB of f32 activation per live tile at the widest layer). ----
    batch8 = _ceil_to(batch, 8)
    tb_cap = max(8, min(512, _floor_to((4 * 2 ** 20) // (4 * widest), 8)))
    if batch8 <= 8:
        tb = batch8
    else:
        tb = max(8, min(tb_cap, _ceil_to(pl.cdiv(batch8, 2), 8)))
    batch_pad = _ceil_to(batch8, tb)
    grid = (batch_pad // tb,)

    # ---- Zero-pad parameters per layer; weights pre-cast to the MXU operand dtype. ----
    w_pads, b_pads = [], []
    for l, (w, b) in enumerate(linears):
        pin, pout = padded[l], padded[l + 1]
        w_pads.append(
            jnp.pad(w, ((0, pin - w.shape[0]), (0, pout - w.shape[1]))).astype(compute_dtype))
        b_pads.append(
            jnp.pad(b, ((0, pout - b.shape[0]),)).reshape(1, pout).astype(jnp.float32))
    g_pads, be_pads = [], []
    for l, (g, be) in enumerate(norms):
        pout = padded[l + 1]
        g_pads.append(jnp.pad(g, ((0, pout - g.shape[0]),)).reshape(1, pout).astype(jnp.float32))
        be_pads.append(jnp.pad(be, ((0, pout - be.shape[0]),)).reshape(1, pout).astype(jnp.float32))

    x_pad = jnp.pad(x.astype(jnp.float32),
                    ((0, batch_pad - batch), (0, p_in - input_size)))

    param_arrays = w_pads + b_pads + g_pads + be_pads
    in_specs = [pl.BlockSpec((tb, p_in), lambda i: (i, 0))]
    in_specs += [_resident_spec(tuple(int(d) for d in a.shape)) for a in param_arrays]
    out_spec = pl.BlockSpec((tb, p_out), lambda i: (i, 0))

    # ---- Explicit VMEM budget (params budgeted x2 in case single-buffering is unavailable). ----
    param_bytes = sum(int(a.size) * a.dtype.itemsize for a in param_arrays)
    io_bytes = 2 * (tb * p_in * 4) + 2 * (tb * p_out * 4)   # double-buffered in/out tiles
    work_bytes = 6 * tb * widest * 4                         # f32 intermediates headroom
    need = 2 * param_bytes + io_bytes + work_bytes
    try:
        vmem_cap = int(pltpu.get_tpu_info().vmem_capacity_bytes)   # 64 MiB v7x, 128 MiB v5e/v6e
    except Exception:
        vmem_cap = 64 * 2 ** 20
    vmem_limit = int(min(max(2 * need, 32 * 2 ** 20), int(0.85 * vmem_cap)))

    kernel = functools.partial(
        _ffn_kernel,
        n_layers=n_layers,
        n_hidden=n_hidden,
        norm_dims=hidden_sizes,
        compute_dtype=compute_dtype,
    )

    cost = pl.CostEstimate(
        flops=int(2 * batch_pad * sum(padded[l] * padded[l + 1] for l in range(n_layers))),
        transcendentals=int(batch_pad * sum(padded[1:-1])),
        bytes_accessed=int(4 * batch_pad * p_in + param_bytes + 4 * batch_pad * p_out),
    )

    out = pl.pallas_call(
        kernel,
        out_shape=jax.ShapeDtypeStruct((batch_pad, p_out), jnp.float32),
        grid=grid,
        in_specs=in_specs,
        out_specs=out_spec,
        compiler_params=pltpu.CompilerParams(
            dimension_semantics=("parallel",),
            vmem_limit_bytes=vmem_limit),
        cost_estimate=cost,
    )(x_pad, *param_arrays)

    return out[:batch, :output_size]


def _reference(x, params):
    """Pure-JAX reference (matches PyTorch inference semantics)."""
    def lin(x, w, b):
        return x @ w + b

    def ln(x, g, be):
        m = jnp.mean(x, axis=-1, keepdims=True)
        v = jnp.mean((x - m) ** 2, axis=-1, keepdims=True)
        return (x - m) * jax.lax.rsqrt(v + _LN_EPS) * g + be

    h = x
    for i in range(len(params["norms"])):
        w, b = params["linears"][i]
        g, be = params["norms"][i]
        h = _gelu_exact(ln(lin(h, w, b), g, be))
    w, b = params["linears"][-1]
    return lin(h, w, b)


if __name__ == "__main__":
    key = jax.random.PRNGKey(0)
    input_size, hidden_sizes, output_size = 32, [64, 48], 16
    batch = 8

    kparams, kx = jax.random.split(key)
    params = init_params(kparams, input_size, hidden_sizes, output_size)
    x = jax.random.normal(kx, (batch, input_size), jnp.float32)

    y_ref = _reference(x, params)

    # f32 MXU-operand path: tight check against the reference.
    y_f32 = jax.block_until_ready(feedforward_nn(x, params, compute_dtype=jnp.float32))
    assert y_f32.shape == (batch, output_size)
    assert jnp.allclose(y_f32, y_ref, atol=1e-4, rtol=1e-4), "f32 mismatch vs reference"

    # Default bf16 MXU-operand path (fast path): expected bf16 quantization error -> looser tol.
    y_bf16 = jax.block_until_ready(feedforward_nn(x, params))
    assert y_bf16.shape == (batch, output_size)
    assert jnp.allclose(y_bf16, y_ref, atol=5e-2, rtol=5e-2), "bf16 mismatch vs reference"

    print("KERNEL_OK")
</pallas_src>

<mosaic_0001>
module attributes {stable_mosaic.version = 11 : i64} {
  func.func @_ffn_kernel(%arg0: i32, %arg1: memref<8x128xf32, #tpu.memory_space<vmem>>, %arg2: memref<128x128xf32, #tpu.memory_space<vmem>>, %arg3: memref<128x128xf32, #tpu.memory_space<vmem>>, %arg4: memref<128x128xf32, #tpu.memory_space<vmem>>, %arg5: memref<1x128xf32, #tpu.memory_space<vmem>>, %arg6: memref<1x128xf32, #tpu.memory_space<vmem>>, %arg7: memref<1x128xf32, #tpu.memory_space<vmem>>, %arg8: memref<1x128xf32, #tpu.memory_space<vmem>>, %arg9: memref<1x128xf32, #tpu.memory_space<vmem>>, %arg10: memref<1x128xf32, #tpu.memory_space<vmem>>, %arg11: memref<1x128xf32, #tpu.memory_space<vmem>>, %arg12: memref<8x128xf32, #tpu.memory_space<vmem>>) attributes {dimension_semantics = [#tpu.dimension_semantics<parallel>], iteration_bounds = array<i64: 1>, scalar_prefetch = 0 : i64, scratch_operands = 0 : i64, tpu.core_type = #tpu.core_type<tc>, window_params = [{transform_indices = @transform_0, window_bounds = array<i64: 8, 128>}, {pipeline_mode = #tpu.pipeline_mode<synchronous>, transform_indices = @transform_1, window_bounds = array<i64: 128, 128>}, {pipeline_mode = #tpu.pipeline_mode<synchronous>, transform_indices = @transform_2, window_bounds = array<i64: 128, 128>}, {pipeline_mode = #tpu.pipeline_mode<synchronous>, transform_indices = @transform_3, window_bounds = array<i64: 128, 128>}, {pipeline_mode = #tpu.pipeline_mode<synchronous>, transform_indices = @transform_4, window_bounds = array<i64: 1, 128>}, {pipeline_mode = #tpu.pipeline_mode<synchronous>, transform_indices = @transform_5, window_bounds = array<i64: 1, 128>}, {pipeline_mode = #tpu.pipeline_mode<synchronous>, transform_indices = @transform_6, window_bounds = array<i64: 1, 128>}, {pipeline_mode = #tpu.pipeline_mode<synchronous>, transform_indices = @transform_7, window_bounds = array<i64: 1, 128>}, {pipeline_mode = #tpu.pipeline_mode<synchronous>, transform_indices = @transform_8, window_bounds = array<i64: 1, 128>}, {pipeline_mode = #tpu.pipeline_mode<synchronous>, transform_indices = @transform_9, window_bounds = array<i64: 1, 128>}, {pipeline_mode = #tpu.pipeline_mode<synchronous>, transform_indices = @transform_10, window_bounds = array<i64: 1, 128>}, {transform_indices = @transform_11, window_bounds = array<i64: 8, 128>}]} {
    %c0 = arith.constant 0 : index
    %c0_0 = arith.constant 0 : index
    %0 = vector.load %arg1[%c0, %c0_0] : memref<8x128xf32, #tpu.memory_space<vmem>>, vector<8x128xf32>
    %c0_1 = arith.constant 0 : index
    %c0_2 = arith.constant 0 : index
    %1 = vector.load %arg2[%c0_1, %c0_2] : memref<128x128xf32, #tpu.memory_space<vmem>>, vector<128x128xf32>
    %cst = arith.constant dense<0.000000e+00> : vector<8x128xf32>
    %2 = tpu.matmul %0, %1, %cst {dimension_numbers = #tpu.dot_dimension_numbers<[1], [0], [0], [1], [0, 0, 1, 1], [], []>} : vector<8x128xf32>, vector<128x128xf32>, vector<8x128xf32> -> vector<8x128xf32>
    %c0_3 = arith.constant 0 : index
    %c0_4 = arith.constant 0 : index
    %3 = vector.load %arg5[%c0_3, %c0_4] : memref<1x128xf32, #tpu.memory_space<vmem>>, vector<1x128xf32>
    %4 = vector.broadcast %3 : vector<1x128xf32> to vector<8x128xf32>
    %5 = arith.addf %2, %4 : vector<8x128xf32>
    %cst_5 = arith.constant dense<0.000000e+00> : vector<8xf32>
    %6 = vector.multi_reduction <add>, %5, %cst_5 [1] : vector<8x128xf32> to vector<8xf32>
    %7 = vector.shape_cast %6 : vector<8xf32> to vector<8x1xf32>
    %8 = arith.mulf %5, %5 : vector<8x128xf32>
    %cst_6 = arith.constant dense<0.000000e+00> : vector<8xf32>
    %9 = vector.multi_reduction <add>, %8, %cst_6 [1] : vector<8x128xf32> to vector<8xf32>
    %10 = vector.shape_cast %9 : vector<8xf32> to vector<8x1xf32>
    %cst_7 = arith.constant 1.562500e-02 : f32
    %11 = vector.broadcast %cst_7 : f32 to vector<8x1xf32>
    %12 = arith.mulf %7, %11 : vector<8x1xf32>
    %cst_8 = arith.constant 1.562500e-02 : f32
    %13 = vector.broadcast %cst_8 : f32 to vector<8x1xf32>
    %14 = arith.mulf %10, %13 : vector<8x1xf32>
    %15 = arith.mulf %12, %12 : vector<8x1xf32>
    %16 = arith.subf %14, %15 : vector<8x1xf32>
    %cst_9 = arith.constant 0.000000e+00 : f32
    %17 = vector.broadcast %cst_9 : f32 to vector<8x1xf32>
    %18 = arith.maximumf %16, %17 : vector<8x1xf32>
    %19 = vector.broadcast %12 : vector<8x1xf32> to vector<8x128xf32>
    %20 = arith.subf %5, %19 : vector<8x128xf32>
    %cst_10 = arith.constant 9.99999974E-6 : f32
    %21 = vector.broadcast %cst_10 : f32 to vector<8x1xf32>
    %22 = arith.addf %18, %21 : vector<8x1xf32>
    %23 = math.rsqrt %22 : vector<8x1xf32>
    %24 = vector.broadcast %23 : vector<8x1xf32> to vector<8x128xf32>
    %25 = arith.mulf %20, %24 : vector<8x128xf32>
    %c0_11 = arith.constant 0 : index
    %c0_12 = arith.constant 0 : index
    %26 = vector.load %arg8[%c0_11, %c0_12] : memref<1x128xf32, #tpu.memory_space<vmem>>, vector<1x128xf32>
    %27 = vector.broadcast %26 : vector<1x128xf32> to vector<8x128xf32>
    %28 = arith.mulf %25, %27 : vector<8x128xf32>
    %c0_13 = arith.constant 0 : index
    %c0_14 = arith.constant 0 : index
    %29 = vector.load %arg10[%c0_13, %c0_14] : memref<1x128xf32, #tpu.memory_space<vmem>>, vector<1x128xf32>
    %30 = vector.broadcast %29 : vector<1x128xf32> to vector<8x128xf32>
    %31 = arith.addf %28, %30 : vector<8x128xf32>
    %cst_15 = arith.constant 5.000000e-01 : f32
    %32 = vector.broadcast %cst_15 : f32 to vector<8x128xf32>
    %33 = arith.mulf %31, %32 : vector<8x128xf32>
    %cst_16 = arith.constant 0.707106769 : f32
    %34 = vector.broadcast %cst_16 : f32 to vector<8x128xf32>
    %35 = arith.mulf %31, %34 : vector<8x128xf32>
    %36 = math.erf %35 : vector<8x128xf32>
    %cst_17 = arith.constant 1.000000e+00 : f32
    %37 = vector.broadcast %cst_17 : f32 to vector<8x128xf32>
    %38 = arith.addf %37, %36 : vector<8x128xf32>
    %39 = arith.mulf %33, %38 : vector<8x128xf32>
    %c0_18 = arith.constant 0 : index
    %c0_19 = arith.constant 0 : index
    %40 = vector.load %arg3[%c0_18, %c0_19] : memref<128x128xf32, #tpu.memory_space<vmem>>, vector<128x128xf32>
    %cst_20 = arith.constant dense<0.000000e+00> : vector<8x128xf32>
    %41 = tpu.matmul %39, %40, %cst_20 {dimension_numbers = #tpu.dot_dimension_numbers<[1], [0], [0], [1], [0, 0, 1, 1], [], []>} : vector<8x128xf32>, vector<128x128xf32>, vector<8x128xf32> -> vector<8x128xf32>
    %c0_21 = arith.constant 0 : index
    %c0_22 = arith.constant 0 : index
    %42 = vector.load %arg6[%c0_21, %c0_22] : memref<1x128xf32, #tpu.memory_space<vmem>>, vector<1x128xf32>
    %43 = vector.broadcast %42 : vector<1x128xf32> to vector<8x128xf32>
    %44 = arith.addf %41, %43 : vector<8x128xf32>
    %cst_23 = arith.constant dense<0.000000e+00> : vector<8xf32>
    %45 = vector.multi_reduction <add>, %44, %cst_23 [1] : vector<8x128xf32> to vector<8xf32>
    %46 = vector.shape_cast %45 : vector<8xf32> to vector<8x1xf32>
    %47 = arith.mulf %44, %44 : vector<8x128xf32>
    %cst_24 = arith.constant dense<0.000000e+00> : vector<8xf32>
    %48 = vector.multi_reduction <add>, %47, %cst_24 [1] : vector<8x128xf32> to vector<8xf32>
    %49 = vector.shape_cast %48 : vector<8xf32> to vector<8x1xf32>
    %cst_25 = arith.constant 0.020833334 : f32
    %50 = vector.broadcast %cst_25 : f32 to vector<8x1xf32>
    %51 = arith.mulf %46, %50 : vector<8x1xf32>
    %cst_26 = arith.constant 0.020833334 : f32
    %52 = vector.broadcast %cst_26 : f32 to vector<8x1xf32>
    %53 = arith.mulf %49, %52 : vector<8x1xf32>
    %54 = arith.mulf %51, %51 : vector<8x1xf32>
    %55 = arith.subf %53, %54 : vector<8x1xf32>
    %cst_27 = arith.constant 0.000000e+00 : f32
    %56 = vector.broadcast %cst_27 : f32 to vector<8x1xf32>
    %57 = arith.maximumf %55, %56 : vector<8x1xf32>
    %58 = vector.broadcast %51 : vector<8x1xf32> to vector<8x128xf32>
    %59 = arith.subf %44, %58 : vector<8x128xf32>
    %cst_28 = arith.constant 9.99999974E-6 : f32
    %60 = vector.broadcast %cst_28 : f32 to vector<8x1xf32>
    %61 = arith.addf %57, %60 : vector<8x1xf32>
    %62 = math.rsqrt %61 : vector<8x1xf32>
    %63 = vector.broadcast %62 : vector<8x1xf32> to vector<8x128xf32>
    %64 = arith.mulf %59, %63 : vector<8x128xf32>
    %c0_29 = arith.constant 0 : index
    %c0_30 = arith.constant 0 : index
    %65 = vector.load %arg9[%c0_29, %c0_30] : memref<1x128xf32, #tpu.memory_space<vmem>>, vector<1x128xf32>
    %66 = vector.broadcast %65 : vector<1x128xf32> to vector<8x128xf32>
    %67 = arith.mulf %64, %66 : vector<8x128xf32>
    %c0_31 = arith.constant 0 : index
    %c0_32 = arith.constant 0 : index
    %68 = vector.load %arg11[%c0_31, %c0_32] : memref<1x128xf32, #tpu.memory_space<vmem>>, vector<1x128xf32>
    %69 = vector.broadcast %68 : vector<1x128xf32> to vector<8x128xf32>
    %70 = arith.addf %67, %69 : vector<8x128xf32>
    %cst_33 = arith.constant 5.000000e-01 : f32
    %71 = vector.broadcast %cst_33 : f32 to vector<8x128xf32>
    %72 = arith.mulf %70, %71 : vector<8x128xf32>
    %cst_34 = arith.constant 0.707106769 : f32
    %73 = vector.broadcast %cst_34 : f32 to vector<8x128xf32>
    %74 = arith.mulf %70, %73 : vector<8x128xf32>
    %75 = math.erf %74 : vector<8x128xf32>
    %cst_35 = arith.constant 1.000000e+00 : f32
    %76 = vector.broadcast %cst_35 : f32 to vector<8x128xf32>
    %77 = arith.addf %76, %75 : vector<8x128xf32>
    %78 = arith.mulf %72, %77 : vector<8x128xf32>
    %c0_36 = arith.constant 0 : index
    %c0_37 = arith.constant 0 : index
    %79 = vector.load %arg4[%c0_36, %c0_37] : memref<128x128xf32, #tpu.memory_space<vmem>>, vector<128x128xf32>
    %cst_38 = arith.constant dense<0.000000e+00> : vector<8x128xf32>
    %80 = tpu.matmul %78, %79, %cst_38 {dimension_numbers = #tpu.dot_dimension_numbers<[1], [0], [0], [1], [0, 0, 1, 1], [], []>} : vector<8x128xf32>, vector<128x128xf32>, vector<8x128xf32> -> vector<8x128xf32>
    %c0_39 = arith.constant 0 : index
    %c0_40 = arith.constant 0 : index
    %81 = vector.load %arg7[%c0_39, %c0_40] : memref<1x128xf32, #tpu.memory_space<vmem>>, vector<1x128xf32>
    %82 = vector.broadcast %81 : vector<1x128xf32> to vector<8x128xf32>
    %83 = arith.addf %80, %82 : vector<8x128xf32>
    %c0_41 = arith.constant 0 : index
    %c0_42 = arith.constant 0 : index
    %84 = vector.load %arg12[%c0_41, %c0_42] : memref<8x128xf32, #tpu.memory_space<vmem>>, vector<8x128xf32>
    tpu.vector_store %arg12[%c0_41, %c0_42], %83 {strides = array<i32>} : memref<8x128xf32, #tpu.memory_space<vmem>>, vector<8x128xf32>,
    return
  }
  func.func @transform_0(%arg0: i32) -> (i32, i32) {
    %c0_i32 = arith.constant 0 : i32
    %c0_i32_0 = arith.constant 0 : i32
    return %arg0, %c0_i32 : i32, i32
  }
  func.func @transform_1(%arg0: i32) -> (i32, i32) {
    %c0_i32 = arith.constant 0 : i32
    %c0_i32_0 = arith.constant 0 : i32
    %c0_i32_1 = arith.constant 0 : i32
    return %c0_i32, %c0_i32_0 : i32, i32
  }
  func.func @transform_2(%arg0: i32) -> (i32, i32) {
    %c0_i32 = arith.constant 0 : i32
    %c0_i32_0 = arith.constant 0 : i32
    %c0_i32_1 = arith.constant 0 : i32
    return %c0_i32, %c0_i32_0 : i32, i32
  }
  func.func @transform_3(%arg0: i32) -> (i32, i32) {
    %c0_i32 = arith.constant 0 : i32
    %c0_i32_0 = arith.constant 0 : i32
    %c0_i32_1 = arith.constant 0 : i32
    return %c0_i32, %c0_i32_0 : i32, i32
  }
  func.func @transform_4(%arg0: i32) -> (i32, i32) {
    %c0_i32 = arith.constant 0 : i32
    %c0_i32_0 = arith.constant 0 : i32
    %c0_i32_1 = arith.constant 0 : i32
    return %c0_i32, %c0_i32_0 : i32, i32
  }
  func.func @transform_5(%arg0: i32) -> (i32, i32) {
    %c0_i32 = arith.constant 0 : i32
    %c0_i32_0 = arith.constant 0 : i32
    %c0_i32_1 = arith.constant 0 : i32
    return %c0_i32, %c0_i32_0 : i32, i32
  }
  func.func @transform_6(%arg0: i32) -> (i32, i32) {
    %c0_i32 = arith.constant 0 : i32
    %c0_i32_0 = arith.constant 0 : i32
    %c0_i32_1 = arith.constant 0 : i32
    return %c0_i32, %c0_i32_0 : i32, i32
  }
  func.func @transform_7(%arg0: i32) -> (i32, i32) {
    %c0_i32 = arith.constant 0 : i32
    %c0_i32_0 = arith.constant 0 : i32
    %c0_i32_1 = arith.constant 0 : i32
    return %c0_i32, %c0_i32_0 : i32, i32
  }
  func.func @transform_8(%arg0: i32) -> (i32, i32) {
    %c0_i32 = arith.constant 0 : i32
    %c0_i32_0 = arith.constant 0 : i32
    %c0_i32_1 = arith.constant 0 : i32
    return %c0_i32, %c0_i32_0 : i32, i32
  }
  func.func @transform_9(%arg0: i32) -> (i32, i32) {
    %c0_i32 = arith.constant 0 : i32
    %c0_i32_0 = arith.constant 0 : i32
    %c0_i32_1 = arith.constant 0 : i32
    return %c0_i32, %c0_i32_0 : i32, i32
  }
  func.func @transform_10(%arg0: i32) -> (i32, i32) {
    %c0_i32 = arith.constant 0 : i32
    %c0_i32_0 = arith.constant 0 : i32
    %c0_i32_1 = arith.constant 0 : i32
    return %c0_i32, %c0_i32_0 : i32, i32
  }
  func.func @transform_11(%arg0: i32) -> (i32, i32) {
    %c0_i32 = arith.constant 0 : i32
    %c0_i32_0 = arith.constant 0 : i32
    return %arg0, %c0_i32 : i32, i32
  }
}

</mosaic_0001>

<bundles_post_ra>
// kernel: feedforward_nn.1
= control target key start
LH: loop header
LB: loop body
LE: loop exit
PB: predicated region body
PF: predicated region fallthrough
CT: control target
= control target key end

     0   :  { %v675_v3 = vmov 0.0|0.0   ;;  %vm676_vm0 = vmmov 0   ;;  %v677_v6 = vmov 0.0   ;;  %s946_s0 = inlined_call_operand.vmem [shape: f32[8,128], index: 0, kind: input, shape index: {}]   ;;  %s947_s1 = inlined_call_operand.vmem [shape: f32[128,128], index: 1, kind: input, shape index: {}]   ;;  %s948_s2 = inlined_call_operand.vmem [shape: f32[128,128], index: 2, kind: input, shape index: {}]   ;;  %s949_s3 = inlined_call_operand.vmem [shape: f32[128,128], index: 3, kind: input, shape index: {}]   ;;  %s950_s4 = inlined_call_operand.vmem [shape: f32[1,128], index: 4, kind: input, shape index: {}]   ;;  %s951_s5 = inlined_call_operand.vmem [shape: f32[1,128], index: 5, kind: input, shape index: {}]   ;;  %s952_s6 = inlined_call_operand.vmem [shape: f32[1,128], index: 6, kind: input, shape index: {}]   ;;  %s953_s7 = inlined_call_operand.vmem [shape: f32[1,128], index: 7, kind: input, shape index: {}]   ;;  %s954_s8 = inlined_call_operand.vmem [shape: f32[1,128], index: 8, kind: input, shape index: {}]   ;;  %s955_s9 = inlined_call_operand.vmem [shape: f32[1,128], index: 9, kind: input, shape index: {}]   ;;  %s956_s10 = inlined_call_operand.vmem [shape: f32[1,128], index: 10, kind: input, shape index: {}]   ;;  %s957_s11 = inlined_call_operand.hbm [shape: f32[8,128], index: 11, kind: output, shape index: {}]  }
   0x1   :  { %v40_v0 = vld [vmem:[%s947_s1] sm:$0xff]  ;;  %v41_v1 = vld [vmem:[%s947_s1 + $0x8] sm:$0xff]  ;;  %v42_v2 = vld [vmem:[%s947_s1 + $0x10] sm:$0xff]  ;;  %567 = vmatprep.subr.bf16.mxu0 %v675_v3  ;;  %494 = vmatprep.mubr.msk.f32.mxu0 %vm676_vm0, %v677_v6 }
   0x2   :  { %v568_v4 = vpack.c.bf16 %v41_v1, %v40_v0  ;;  %v43_v5 = vld [vmem:[%s947_s1 + $0x18] sm:$0xff]  ;;  %591 = vmatprep.subr.bf16.mxu1 %v675_v3  ;;  %529 = vmatprep.mubr.msk.f32.mxu1 %vm676_vm0, %v677_v6  ;;  %v44_v8 = vld [vmem:[%s947_s1 + $0x20] sm:$0xff]  ;;  %v45_v9 = vld [vmem:[%s947_s1 + $0x28] sm:$0xff] }
   0x3   :  { %v571_v7 = vpack.c.bf16 %v43_v5, %v42_v2 }
   0x4   :  { %569 = vmatpush3.bf16.msra.mxu0 %v568_v4 }
   0x5   :  { %570 = vmatprep.subr.bf16.mxu0 %v675_v3 }
   0x6   :  { %16 = vsyncpa [#allocation3], 0  ;;  %v574_v10 = vpack.c.bf16 %v45_v9, %v44_v8  ;;  %v46_v11 = vld [vmem:[%s947_s1 + $0x30] sm:$0xff]  ;;  %v47_v12 = vld [vmem:[%s947_s1 + $0x38] sm:$0xff]  ;;  %s678_s15 = smov [#allocation2]  }
   0x7   :  { %v577_v13 = vpack.c.bf16 %v47_v12, %v46_v11  ;;  %v48_v14 = vld [vmem:[%s947_s1 + $0x40] sm:$0xff]  ;;  %v49_v15 = vld [vmem:[%s947_s1 + $0x48] sm:$0xff]  ;;  %v50_v17 = vld [vmem:[%s947_s1 + $0x50] sm:$0xff] }
   0x8   :  { %572 = vmatpush3.bf16.msra.mxu0 %v571_v7  ;;  %v580_v16 = vpack.c.bf16 %v49_v15, %v48_v14  ;;  %v51_v18 = vld [vmem:[%s947_s1 + $0x58] sm:$0xff]  ;;  %v52_v20 = vld [vmem:[%s947_s1 + $0x60] sm:$0xff]  ;;  %v53_v21 = vld [vmem:[%s947_s1 + $0x68] sm:$0xff] }
   0x9   :  { %573 = vmatprep.subr.bf16.mxu0 %v675_v3  ;;  %v583_v19 = vpack.c.bf16 %v51_v18, %v50_v17  ;;  %v586_v22 = vpack.c.bf16 %v53_v21, %v52_v20  ;;  %v54_v23 = vld [vmem:[%s947_s1 + $0x70] sm:$0xff]  ;;  %v55_v24 = vld [vmem:[%s947_s1 + $0x78] sm:$0xff]  ;;  %v39_v26 = vld [vmem:[%s946_s0] sm:$0xff] }
   0xa   :  { %v589_v25 = vpack.c.bf16 %v55_v24, %v54_v23  ;;  %v404_v27 = vld [vmem:[%s950_s4] ss:$0 sm:$0xff]  ;;  %v169_v33 = vld [vmem:[%s948_s2 + $0x8] sm:$0xff]  ;;  %v170_v34 = vld [vmem:[%s948_s2 + $0x10] sm:$0xff] }
   0xb   :  { %v168_v32 = vld [vmem:[%s948_s2] sm:$0xff]  ;;  %v171_v36 = vld [vmem:[%s948_s2 + $0x18] sm:$0xff]  ;;  %v173_v39 = vld [vmem:[%s948_s2 + $0x28] sm:$0xff] }
   0xc   :  { %575 = vmatpush3.bf16.msra.mxu0 %v574_v10  ;;  %v592_v35 = vpack.c.bf16 %v169_v33, %v168_v32  ;;  %v595_v37 = vpack.c.bf16 %v171_v36, %v170_v34  ;;  %v172_v38 = vld [vmem:[%s948_s2 + $0x20] sm:$0xff]  ;;  %v174_v41 = vld [vmem:[%s948_s2 + $0x30] sm:$0xff]  ;;  %v175_v42 = vld [vmem:[%s948_s2 + $0x38] sm:$0xff] }
   0xd   :  { %576 = vmatprep.subr.bf16.mxu0 %v675_v3  ;;  %v598_v40 = vpack.c.bf16 %v173_v39, %v172_v38  ;;  %v601_v43 = vpack.c.bf16 %v175_v42, %v174_v41  ;;  %v176_v44 = vld [vmem:[%s948_s2 + $0x40] sm:$0xff]  ;;  %v177_v45 = vld [vmem:[%s948_s2 + $0x48] sm:$0xff]  ;;  %v178_v47 = vld [vmem:[%s948_s2 + $0x50] sm:$0xff] }
   0xe   :  { %593 = vmatpush3.bf16.msra.mxu1 %v592_v35  ;;  %v604_v46 = vpack.c.bf16 %v177_v45, %v176_v44  ;;  %v179_v48 = vld [vmem:[%s948_s2 + $0x58] sm:$0xff]  ;;  %v180_v50 = vld [vmem:[%s948_s2 + $0x60] sm:$0xff]  ;;  %v181_v51 = vld [vmem:[%s948_s2 + $0x68] sm:$0xff] }
   0xf   :  { %594 = vmatprep.subr.bf16.mxu1 %v675_v3  ;;  %v607_v49 = vpack.c.bf16 %v179_v48, %v178_v47  ;;  %v610_v52 = vpack.c.bf16 %v181_v51, %v180_v50  ;;  %v182_v53 = vld [vmem:[%s948_s2 + $0x70] sm:$0xff]  ;;  %v183_v54 = vld [vmem:[%s948_s2 + $0x78] sm:$0xff]  ;;  %v405_v2 = vld [vmem:[%s953_s7] ss:$0 sm:$0xff] }
  0x10   :  { %578 = vmatpush3.bf16.msra.mxu0 %v577_v13  ;;  %v613_v55 = vpack.c.bf16 %v183_v54, %v182_v53  ;;  %v406_v5 = vld [vmem:[%s955_s9] ss:$0 sm:$0xff]  ;;  %v298_v21 = vld [vmem:[%s949_s3 + $0x10] sm:$0xff]  ;;  %v307_v34 = vld [vmem:[%s949_s3 + $0x58] sm:$0xff] }
  0x11   :  { %579 = vmatprep.subr.bf16.mxu0 %v675_v3  ;;  %v407_v13 = vld [vmem:[%s951_s5] ss:$0 sm:$0xff]  ;;  %v306_v33 = vld [vmem:[%s949_s3 + $0x50] sm:$0xff] }
  0x12   :  { %596 = vmatpush3.bf16.msra.mxu1 %v595_v37  ;;  %v296_v18 = vld [vmem:[%s949_s3] sm:$0xff]  ;;  %v631_v35 = vpack.c.bf16 %v307_v34, %v306_v33  ;;  %v309_v37 = vld [vmem:[%s949_s3 + $0x68] sm:$0xff]  ;;  %v310_v39 = vld [vmem:[%s949_s3 + $0x70] sm:$0xff] }
  0x13   :  { %597 = vmatprep.subr.bf16.mxu1 %v675_v3  ;;  %v300_v24 = vld [vmem:[%s949_s3 + $0x20] sm:$0xff] }
  0x14   :  { %581 = vmatpush3.bf16.msra.mxu0 %v580_v16  ;;  %v308_v36 = vld [vmem:[%s949_s3 + $0x60] sm:$0xff] }
  0x15   :  { %582 = vmatprep.subr.bf16.mxu0 %v675_v3  ;;  %v634_v38 = vpack.c.bf16 %v309_v37, %v308_v36 }
  0x16   :  { %599 = vmatpush3.bf16.msra.mxu1 %v598_v40  ;;  %v311_v40 = vld [vmem:[%s949_s3 + $0x78] sm:$0xff] }
  0x17   :  { %600 = vmatprep.subr.bf16.mxu1 %v675_v3  ;;  %v637_v41 = vpack.c.bf16 %v311_v40, %v310_v39 }
  0x18   :  { %584 = vmatpush3.bf16.msra.mxu0 %v583_v19  ;;  %v297_v19 = vld [vmem:[%s949_s3 + $0x8] sm:$0xff] }
  0x19   :  { %585 = vmatprep.subr.bf16.mxu0 %v675_v3  ;;  %v616_v20 = vpack.c.bf16 %v297_v19, %v296_v18 }
  0x1a   :  { %602 = vmatpush3.bf16.msra.mxu1 %v601_v43 }
  0x1b   :  { %603 = vmatprep.subr.bf16.mxu1 %v675_v3 }
  0x1c   :  { %587 = vmatpush3.bf16.msra.mxu0 %v586_v22  ;;  %v299_v22 = vld [vmem:[%s949_s3 + $0x18] sm:$0xff] }
  0x1d   :  { %588 = vmatprep.subr.bf16.mxu0 %v675_v3  ;;  %v619_v23 = vpack.c.bf16 %v299_v22, %v298_v21 }
  0x1e   :  { %605 = vmatpush3.bf16.msra.mxu1 %v604_v46 }
  0x1f   :  { %606 = vmatprep.subr.bf16.mxu1 %v675_v3 }
  0x20   :  { %590 = vmatpush3.bf16.msra.mxu0 %v589_v25  ;;  %v301_v25 = vld [vmem:[%s949_s3 + $0x28] sm:$0xff] }
  0x21   :  { %615 = vmatprep.subr.bf16.mxu0 %v675_v3 }
  0x22   :  { %608 = vmatpush3.bf16.msra.mxu1 %v607_v49 }
  0x23   :  { %495 = vmatmul.mubr.f32.vlgmr.msra.gmra.mrb[0].mxu0 %v39_v26  ;;  %609 = vmatprep.subr.bf16.mxu1 %v675_v3  ;;  %v622_v26 = vpack.c.bf16 %v301_v25, %v300_v24 }
  0x24   :  { %564 = vmatprep.mubr.msk.f32.mxu0 %vm676_vm0, %v677_v6  ;;  %617 = vmatpush3.bf16.msra.mxu0 %v616_v20 }
  0x25   :  { %618 = vmatprep.subr.bf16.mxu0 %v675_v3 }
  0x26   :  { %611 = vmatpush3.bf16.msra.mxu1 %v610_v52  ;;  %v408_v52 = vld [vmem:[%s954_s8] ss:$0 sm:$0xff]  ;;  %s396_s8 = sshll.u32 %s678_s15, 4  ;;  %s397_s8 = int_to_ptr.vmem [resolvable:$true] %s396_s8 }
  0x27   :  { %612 = vmatprep.subr.bf16.mxu1 %v675_v3  ;;  %p656_p1 = scmp.lt.s32.totalorder %s397_s8, %s397_s8 }
  0x28   :  { %620 = vmatpush3.bf16.msra.mxu0 %v619_v23 }
  0x29   :  { %621 = vmatprep.subr.bf16.mxu0 %v675_v3 }
  0x2a   :  { %614 = vmatpush3.bf16.msra.mxu1 %v613_v55 }
  0x2c   :  { %623 = vmatpush3.bf16.msra.mxu0 %v622_v26 }
  0x2d   :  { %624 = vmatprep.subr.bf16.mxu0 %v675_v3 }
  0xf6   :  { %v129_v28 = vpop.f32.mrb[0].mxu0 }
  0xf7   :  { %v130_v29 = vadd.f32 %v404_v27, %v129_v28  ;;  %v496_v30 = vpop.f32.mrb[1].mxu0  ;;  %v302_v27 = vld [vmem:[%s949_s3 + $0x30] sm:$0xff]  ;;  %v303_v28 = vld [vmem:[%s949_s3 + $0x38] sm:$0xff] }
  0xf8   :  { %v304_v30 = vld [vmem:[%s949_s3 + $0x40] sm:$0xff] }
  0xf9   :  { %133 = vadd.xlane.f32.xlu0 %v130_v29  ;;  %v135_v31 = vmul.f32 %v130_v29, %v130_v29 }
  0xfd   :  { %136 = vadd.xlane.f32.xlu0 %v135_v31  ;;  %v305_v31 = vld [vmem:[%s949_s3 + $0x48] sm:$0xff] }
  0xfe   :  { %v628_v32 = vpack.c.bf16 %v305_v31, %v304_v30 }
 0x186   :  { %v134_v56 = vpop.xlane.xlu0 %133 }
 0x187   :  { %v138_v57 = vmul.f32 0.015625, %v134_v56 }
 0x189   :  { %v140_v59 = vmul.f32 %v138_v57, %v138_v57  ;;  %v143_v0 = vsub.f32 %v130_v29, %v138_v57  ;;  %v625_v29 = vpack.c.bf16 %v303_v28, %v302_v27 }
 0x18a   :  { %v137_v58 = vpop.xlane.xlu0 %136 }
 0x18b   :  { %v139_v60 = vmul.f32 0.015625, %v137_v58  ;;  %626 = vmatpush3.bf16.msra.mxu0 %v625_v29 }
 0x18c   :  { %627 = vmatprep.subr.bf16.mxu0 %v675_v3 }
 0x18d   :  { %v141_v61 = vsub.f32 %v139_v60, %v140_v59 }
 0x18f   :  { %v142_v62 = vmax.f32 %v141_v61, 0.0  ;;  %629 = vmatpush3.bf16.msra.mxu0 %v628_v32  ;;  %v410_v61 = vld [vmem:[%s952_s6] ss:$0 sm:$0xff] }
 0x190   :  { %630 = vmatprep.subr.bf16.mxu0 %v675_v3 }
 0x191   :  { %v144_v63 = vadd.f32 1e-05, %v142_v62 }
 0x193   :  { %643 = vrsqrt.f32 %v144_v63  ;;  %632 = vmatpush3.bf16.msra.mxu0 %v631_v35 }
 0x194   :  { %633 = vmatprep.subr.bf16.mxu0 %v675_v3 }
 0x197   :  { %635 = vmatpush3.bf16.msra.mxu0 %v634_v38 }
 0x198   :  { %636 = vmatprep.subr.bf16.mxu0 %v675_v3  ;;  %v409_v3 = vld [vmem:[%s956_s10] ss:$0 sm:$0xff]  ;;  %s651_s10 = scalar_lea.vmem %s397_s8, 128 }
 0x199   :  { %p652_p0 = scmp.ne.s32.totalorder %s397_s8, %s651_s10  ;;  %p657_p2 = scmp.lt.s32.totalorder %s651_s10, %s651_s10 }
 0x19b   :  { %638 = vmatpush3.bf16.msra.mxu0 %v637_v41  ;;  %p658_p3 = por %p657_p2, %p656_p1 }
 0x19d   :  { %v644_v1 = vpop.eup %643  ;;  %p659_p4 = pnand %p658_p3, %p652_p0 }
 0x19e   :  { %v146_v4 = vmul.f32 %v644_v1, %v143_v0 }
 0x1a0   :  { %v154_v6 = vmul.f32 %v405_v2, %v146_v4 }
 0x1a2   :  { %v162_v7 = vadd.f32 %v406_v5, %v154_v6 }
 0x1a4   :  { %v164_v8 = vmul.f32 0.70710677, %v162_v7  ;;  %v163_v10 = vmul.f32 0.5, %v162_v7 }
 0x1a6   :  { %645 = verf.f32 %v164_v8 }
 0x1b0   :  { %v646_v9 = vpop.eup %645 }
 0x1b1   :  { %v166_v11 = vadd.f32 1.0, %v646_v9 }
 0x1b3   :  { %v167_v12 = vmul.f32 %v166_v11, %v163_v10 }
 0x1b5   :  { %530 = vmatmul.mubr.f32.vlgmr.msra.gmra.mrb[0].mxu1 %v167_v12 }
 0x288   :  { %v257_v14 = vpop.f32.mrb[0].mxu1 }
 0x289   :  { %v258_v15 = vadd.f32 %v407_v13, %v257_v14  ;;  %v531_v16 = vpop.f32.mrb[1].mxu1 }
 0x28b   :  { %261 = vadd.xlane.f32.xlu1 %v258_v15  ;;  %v263_v17 = vmul.f32 %v258_v15, %v258_v15 }
 0x28f   :  { %264 = vadd.xlane.f32.xlu1 %v263_v17 }
 0x318   :  { %v262_v42 = vpop.xlane.xlu1 %261 }
 0x319   :  { %v266_v43 = vmul.f32 0.020833334, %v262_v42 }
 0x31b   :  { %v268_v45 = vmul.f32 %v266_v43, %v266_v43  ;;  %v271_v50 = vsub.f32 %v258_v15, %v266_v43 }
 0x31c   :  { %v265_v44 = vpop.xlane.xlu1 %264 }
 0x31d   :  { %v267_v46 = vmul.f32 0.020833334, %v265_v44 }
 0x31f   :  { %v269_v47 = vsub.f32 %v267_v46, %v268_v45 }
 0x321   :  { %v270_v48 = vmax.f32 %v269_v47, 0.0 }
 0x323   :  { %v272_v49 = vadd.f32 1e-05, %v270_v48 }
 0x325   :  { %647 = vrsqrt.f32 %v272_v49 }
 0x32f   :  { %v648_v51 = vpop.eup %647 }
 0x330   :  { %v274_v53 = vmul.f32 %v648_v51, %v271_v50 }
 0x332   :  { %v282_v54 = vmul.f32 %v408_v52, %v274_v53 }
 0x334   :  { %v290_v55 = vadd.f32 %v409_v3, %v282_v54 }
 0x336   :  { %v292_v56 = vmul.f32 0.70710677, %v290_v55  ;;  %v291_v58 = vmul.f32 0.5, %v290_v55 }
 0x338   :  { %649 = verf.f32 %v292_v56 }
 0x342   :  { %v650_v57 = vpop.eup %649 }
 0x343   :  { %v294_v59 = vadd.f32 1.0, %v650_v57 }
 0x345   :  { %v295_v60 = vmul.f32 %v294_v59, %v291_v58 }
 0x347   :  { %565 = vmatmul.mubr.f32.vlgmr.msra.gmra.mrb[2].mxu0 %v295_v60 }
 0x41a   :  { %v385_v62 = vpop.f32.mrb[2].mxu0 }
 0x41b   :  { %v386_v63 = vadd.f32 %v410_v61, %v385_v62  ;;  %v566_v0 = vpop.f32.mrb[3].mxu0 }
 0x41d   :  { %389 = vst [vmem:[#allocation2] sm:$0xff] %v386_v63 }
 0x41e   :  { %662 = shalt.err (!%p659_p4)
}
 0x41f   :  { %s663_s17 = scalar_lea.hbm %s957_s11, 128 }
 0x420   :  { %p664_p5 = scmp.ne.s32.totalorder %s957_s11, %s663_s17  ;;  %p667_p6 = scmp.lt.u32.totalorder %s663_s17, %s957_s11 }
 0x422   :  { %p669_p7 = pnand %p667_p6, %p664_p5 }
 0x424   :  { %672 = shalt.err (!%p669_p7)
}
 0x425   :  { %399 = dma.vmem_to_hbm [thread:$0]  %s397_s8, 128, %s957_s11, [#allocation3]  }
 0x426   :  { %673 = dma.done.wait [#allocation3], 128  }
 0x427   :  { %674 = vsyncadd [#allocation3], 4294967168 }
 0x428   :  { %403 = vsyncpa [#allocation3], 1 }

</bundles_post_ra>
